<compile_context>
chip_gen: v7x
topology: tpu7x:2x2x1
jax: 0.10.0
libtpu: 0.0.40
codegen_flags: <defaults>
</compile_context>

<pallas_src>
import functools
import jax
import jax.numpy as jnp
from jax.experimental import pallas as pl
from jax.experimental.pallas import tpu as pltpu


LANE = 128


# ----------------------------------------------------------------------------
# helpers
# ----------------------------------------------------------------------------
def _round_up(n, m):
    return ((n + m - 1) // m) * m


def _pad2(x, rows, cols):
    return jnp.pad(x, ((0, rows - x.shape[0]), (0, cols - x.shape[1])))


def quantize_adjacency(a_hat_pad):
    """Symmetric int8 quantization with a single global scale."""
    a_max = jnp.maximum(jnp.max(jnp.abs(a_hat_pad)), 1e-12)
    scale = a_max / 127.0
    a_q = jnp.clip(jnp.round(a_hat_pad / scale), -127, 127).astype(jnp.int8)
    return a_q, scale


# ----------------------------------------------------------------------------
# Pallas kernel: row-tiled linear projection  HW = H @ W  (no bias)
# ----------------------------------------------------------------------------
def _row_linear_kernel(x_ref, w_ref, o_ref):
    o_ref[...] = jnp.dot(
        x_ref[...], w_ref[...], preferred_element_type=jnp.float32
    ).astype(o_ref.dtype)


def row_linear(x, w, out_dtype=jnp.bfloat16, tm=512):
    n, d_in = x.shape
    d_out = w.shape[1]
    tm = min(tm, n)
    assert n % tm == 0, "row tile must divide padded node count"
    return pl.pallas_call(
        _row_linear_kernel,
        out_shape=jax.ShapeDtypeStruct((n, d_out), out_dtype),
        grid=(n // tm,),
        in_specs=[
            pl.BlockSpec((tm, d_in), lambda i: (i, 0)),
            pl.BlockSpec((d_in, d_out), lambda i: (0, 0)),  # weight stays resident
        ],
        out_specs=pl.BlockSpec((tm, d_out), lambda i: (i, 0)),
        compiler_params=pltpu.CompilerParams(dimension_semantics=("parallel",)),
    )(x, w)


# ----------------------------------------------------------------------------
# Pallas kernel: tiled neighborhood aggregation  out = act(A_hat @ HW + b)
# A_hat arrives as int8 (dequant scale pre-folded into the projection weight),
# HW is either VMEM-resident (sliced with pl.ds) or streamed as (tk, d_hw).
# Optionally fused with a trailing linear out @ W2 (used for enc->dec).
# ----------------------------------------------------------------------------
def _agg_kernel(a_ref, hw_ref, b_ref, *rest, tk, hw_resident, fused_w2,
                apply_act, slope):
    if fused_w2:
        w2_ref, o_ref, acc_ref = rest
    else:
        o_ref, acc_ref = rest
        w2_ref = None

    k = pl.program_id(1)

    @pl.when(k == 0)
    def _():
        acc_ref[...] = jnp.zeros_like(acc_ref)

    a = a_ref[...].astype(jnp.bfloat16)  # int8 -> bf16 upcast in VMEM (VPU, cheap)
    if hw_resident:
        koff = pl.multiple_of(k * tk, tk)
        hw = hw_ref[pl.ds(koff, tk), :]
    else:
        hw = hw_ref[...]
    acc_ref[...] += jnp.dot(a, hw, preferred_element_type=jnp.float32)

    @pl.when(k == pl.num_programs(1) - 1)
    def _():
        out = acc_ref[...] + b_ref[...]
        if apply_act:
            out = jnp.where(out > 0, out, slope * out)  # PReLU(0.25) substitute
        if fused_w2:
            out = jnp.dot(out.astype(w2_ref.dtype), w2_ref[...],
                          preferred_element_type=jnp.float32)
        o_ref[...] = out.astype(o_ref.dtype)


def gcn_aggregate(a_q, hw, b, w2=None, apply_act=True, slope=0.25,
                  out_dtype=jnp.bfloat16, tm=512, tk=512,
                  hw_resident_budget=20 * 1024 * 1024,
                  vmem_cap_bytes=64 * 1024 * 1024):
    n = a_q.shape[0]
    d_hw = hw.shape[1]
    d_out = w2.shape[1] if w2 is not None else d_hw
    tm = min(tm, n)
    tk = min(tk, n)
    assert n % tm == 0 and n % tk == 0, "tiles must divide padded node count"

    # Keep the whole HW operand VMEM-resident if (with double buffering) it
    # fits a conservative v7x-safe budget; otherwise stream k-slabs.
    hw_bytes = n * d_hw * hw.dtype.itemsize
    hw_resident = (2 * hw_bytes) <= hw_resident_budget

    in_specs = [pl.BlockSpec((tm, tk), lambda i, k: (i, k))]           # A int8 tile
    if hw_resident:
        in_specs.append(pl.BlockSpec((n, d_hw), lambda i, k: (0, 0)))  # resident HW
    else:
        in_specs.append(pl.BlockSpec((tk, d_hw), lambda i, k: (k, 0)))  # HW k-slab
    in_specs.append(pl.BlockSpec((1, d_hw), lambda i, k: (0, 0)))      # bias (f32)

    args = [a_q, hw, b]
    if w2 is not None:
        in_specs.append(pl.BlockSpec((d_hw, d_out), lambda i, k: (0, 0)))
        args.append(w2)

    kern = functools.partial(
        _agg_kernel, tk=tk, hw_resident=hw_resident, fused_w2=(w2 is not None),
        apply_act=apply_act, slope=slope)

    out_itemsize = jnp.dtype(out_dtype).itemsize
    est = (2 * tm * tk * a_q.dtype.itemsize                       # A tiles (2-buf)
           + (2 * hw_bytes if hw_resident
              else 2 * tk * d_hw * hw.dtype.itemsize)             # HW
           + 2 * d_hw * 4                                         # bias
           + (2 * d_hw * d_out * 2 if w2 is not None else 0)      # fused W2
           + 2 * tm * d_out * out_itemsize                        # output (2-buf)
           + tm * d_hw * 4)                                       # f32 accumulator
    vmem_limit = int(min(vmem_cap_bytes, max(32 * 1024 * 1024, 2 * est)))

    return pl.pallas_call(
        kern,
        out_shape=jax.ShapeDtypeStruct((n, d_out), out_dtype),
        grid=(n // tm, n // tk),
        in_specs=in_specs,
        out_specs=pl.BlockSpec((tm, d_out), lambda i, k: (i, 0)),
        scratch_shapes=[pltpu.VMEM((tm, d_hw), jnp.float32)],
        compiler_params=pltpu.CompilerParams(
            dimension_semantics=("parallel", "arbitrary"),
            vmem_limit_bytes=vmem_limit),
    )(*args)


# ----------------------------------------------------------------------------
# Pallas kernel: tiled SCE loss   mean( (1 - cos(x_rec, x_init))^alpha )
# ----------------------------------------------------------------------------
def _sce_loss_kernel(x_ref, y_ref, o_ref, acc_ref, *, alpha, inv_m):
    i = pl.program_id(0)

    @pl.when(i == 0)
    def _():
        acc_ref[...] = jnp.zeros_like(acc_ref)

    x = x_ref[...].astype(jnp.float32)
    y = y_ref[...].astype(jnp.float32)
    xn = x * jax.lax.rsqrt(jnp.sum(x * x, axis=-1, keepdims=True) + 1e-12)
    yn = y * jax.lax.rsqrt(jnp.sum(y * y, axis=-1, keepdims=True) + 1e-12)
    cos = jnp.sum(xn * yn, axis=-1, keepdims=True)        # (TM, 1)
    loss = (1.0 - cos) ** alpha                            # alpha static int
    acc_ref[...] += jnp.sum(loss, axis=0, keepdims=True)   # (1, 1)

    @pl.when(i == pl.num_programs(0) - 1)
    def _():
        o_ref[...] = acc_ref[...] * inv_m


def sce_loss_pallas(x_rec, x_init, alpha=2, tm=256):
    m, d = x_rec.shape
    mp = _round_up(m, tm)
    pad = mp - m
    if pad:
        # pad both sides with identical rows -> cos = 1 -> zero contribution
        ones_r = jnp.ones((pad, d), x_rec.dtype)
        ones_i = jnp.ones((pad, d), x_init.dtype)
        x_rec = jnp.concatenate([x_rec, ones_r], axis=0)
        x_init = jnp.concatenate([x_init, ones_i], axis=0)

    kern = functools.partial(_sce_loss_kernel, alpha=alpha, inv_m=1.0 / m)
    out = pl.pallas_call(
        kern,
        out_shape=jax.ShapeDtypeStruct((1, 1), jnp.float32),
        grid=(mp // tm,),
        in_specs=[
            pl.BlockSpec((tm, d), lambda i: (i, 0)),
            pl.BlockSpec((tm, d), lambda i: (i, 0)),
        ],
        out_specs=pl.BlockSpec((1, 1), lambda i: (0, 0)),
        scratch_shapes=[pltpu.VMEM((1, 1), jnp.float32)],
        compiler_params=pltpu.CompilerParams(dimension_semantics=("arbitrary",)),
    )(x_rec, x_init)
    return out[0, 0]


# ----------------------------------------------------------------------------
# Model glue (parameters, masking, forward)
# ----------------------------------------------------------------------------
def init_params(key, in_dim, num_hidden, num_layers, in_pad, hid_pad):
    keys = jax.random.split(key, num_layers + 2)
    params = {"enc": [], "enc_mask_token": jnp.zeros((1, in_pad), jnp.float32)}
    d_in, d_in_p = in_dim, in_pad
    for l in range(num_layers):
        w = jax.random.normal(keys[l], (d_in, num_hidden), jnp.float32)
        w = w / jnp.sqrt(d_in)
        params["enc"].append((_pad2(w, d_in_p, hid_pad),
                              jnp.zeros((1, hid_pad), jnp.float32)))
        d_in, d_in_p = num_hidden, hid_pad
    e2d = jax.random.normal(keys[num_layers], (num_hidden, num_hidden),
                            jnp.float32) / jnp.sqrt(num_hidden)
    params["e2d_w"] = _pad2(e2d, hid_pad, hid_pad)
    dec = jax.random.normal(keys[num_layers + 1], (num_hidden, in_dim),
                            jnp.float32) / jnp.sqrt(num_hidden)
    params["dec_w"] = _pad2(dec, hid_pad, in_pad)
    params["dec_b"] = jnp.zeros((1, in_pad), jnp.float32)
    return params


def encoding_mask_noise(key, x_pad, n_nodes, enc_mask_token,
                        mask_rate=0.3, replace_rate=0.1):
    # mirrors model_graphmae.encoding_mask_noise (torch.randperm -> jax perm)
    mask_token_rate = 1.0 - replace_rate
    k1, k2, k3 = jax.random.split(key, 3)
    perm = jax.random.permutation(k1, n_nodes)
    num_mask = int(mask_rate * n_nodes)
    mask_nodes = perm[:num_mask]
    keep_nodes = perm[num_mask:]

    out_x = x_pad
    if replace_rate > 0:
        num_noise = int(replace_rate * num_mask)
        perm_mask = jax.random.permutation(k2, num_mask)
        token_nodes = mask_nodes[perm_mask[: int(mask_token_rate * num_mask)]]
        out_x = out_x.at[token_nodes].set(0.0)
        if num_noise > 0:
            noise_nodes = mask_nodes[perm_mask[-num_noise:]]
            noise_to_be_chosen = jax.random.permutation(k3, n_nodes)[:num_noise]
            out_x = out_x.at[noise_nodes].set(x_pad[noise_to_be_chosen])
    else:
        token_nodes = mask_nodes
        out_x = out_x.at[mask_nodes].set(0.0)
    out_x = out_x.at[token_nodes].add(enc_mask_token[0])
    return out_x, mask_nodes, keep_nodes


def graphmae_forward(params, a_q, a_scale, x_pad, n_nodes, mask_key,
                     mask_rate=0.3, replace_rate=0.1, alpha_l=2,
                     tm=512, tk=512):
    bf16 = jnp.bfloat16
    # 1) mask / noise the input features (host-side gather/scatter glue)
    use_x, mask_nodes, _keep = encoding_mask_noise(
        mask_key, x_pad, n_nodes, params["enc_mask_token"],
        mask_rate, replace_rate)

    # 2) encoder: per layer, hoisted H@W projection + tiled A_hat aggregation.
    #    The int8 dequant scale of A_hat is folded into the projection weight
    #    (A = s*A_q  =>  A@ (H@W) == A_q @ (H @ (s*W)) exactly).
    #    encoder_to_decoder linear is fused into the last layer's epilogue.
    h = use_x
    n_layers = len(params["enc"])
    for l, (w, b) in enumerate(params["enc"]):
        w_scaled = (w * a_scale).astype(bf16)
        hw = row_linear(h.astype(bf16), w_scaled, out_dtype=bf16, tm=tm)
        w2 = params["e2d_w"].astype(bf16) if l == n_layers - 1 else None
        h = gcn_aggregate(a_q, hw, b, w2=w2, apply_act=True,
                          out_dtype=bf16, tm=tm, tk=tk)
    rep = h  # already projected through encoder_to_decoder

    # 3) re-mask the latent codes (decoder_type is not mlp/linear)
    rep = rep.at[mask_nodes].set(0.0)

    # 4) decoder (single message-passing layer back to in_dim)
    dec_w_scaled = (params["dec_w"] * a_scale).astype(bf16)
    hw_dec = row_linear(rep.astype(bf16), dec_w_scaled, out_dtype=bf16, tm=tm)
    recon = gcn_aggregate(a_q, hw_dec, params["dec_b"], w2=None,
                          apply_act=False, out_dtype=jnp.float32, tm=tm, tk=tk)

    # 5) SCE loss on the masked nodes
    x_init = x_pad[mask_nodes]
    x_rec = recon[mask_nodes]
    return sce_loss_pallas(x_rec, x_init, alpha=alpha_l)


def build_ring_adjacency(n):
    idx = jnp.arange(n)
    a = jnp.zeros((n, n), jnp.float32)
    a = a.at[idx, (idx + 1) % n].set(1.0)
    a = a.at[idx, (idx - 1) % n].set(1.0)
    a = a.at[idx, idx].set(1.0)  # self loops
    deg = a.sum(axis=1)
    d_inv_sqrt = 1.0 / jnp.sqrt(deg)
    return d_inv_sqrt[:, None] * a * d_inv_sqrt[None, :]


if __name__ == "__main__":
    N, IN_DIM, NUM_HIDDEN, NUM_LAYERS = 256, 16, 32, 2

    # tile plan: defaults are 512x512 aggregation tiles for large graphs
    # (HBM-roofline sweet spot); this tiny demo graph uses 256 so the padded
    # node count stays small and the v7x 'parallel' i-axis isn't over-collapsed.
    TM = TK = 256
    Np = _round_up(N, max(TM, TK))
    IN_PAD = _round_up(IN_DIM, LANE)
    HID_PAD = _round_up(NUM_HIDDEN, LANE)

    key = jax.random.PRNGKey(0)
    k_param, k_x, k_mask = jax.random.split(key, 3)

    params = init_params(k_param, IN_DIM, NUM_HIDDEN, NUM_LAYERS,
                         IN_PAD, HID_PAD)
    x = jax.random.normal(k_x, (N, IN_DIM), jnp.float32)
    x_pad = _pad2(x, Np, IN_PAD)

    a_hat = build_ring_adjacency(N)
    a_pad = _pad2(a_hat, Np, Np)
    a_q, a_scale = quantize_adjacency(a_pad)   # int8 adjacency, global scale

    loss = graphmae_forward(params, a_q, a_scale, x_pad, N, k_mask,
                            mask_rate=0.3, replace_rate=0.1, alpha_l=2,
                            tm=TM, tk=TK)
    loss = jax.block_until_ready(loss)
    assert jnp.isfinite(loss)
    print("KERNEL_OK")
</pallas_src>

<mosaic_0001>
module attributes {stable_mosaic.version = 11 : i64} {
  func.func @_row_linear_kernel(%arg0: i32, %arg1: memref<256x128xbf16, #tpu.memory_space<vmem>>, %arg2: memref<128x128xbf16, #tpu.memory_space<vmem>>, %arg3: memref<256x128xbf16, #tpu.memory_space<vmem>>) attributes {dimension_semantics = [#tpu.dimension_semantics<parallel>], iteration_bounds = array<i64: 1>, scalar_prefetch = 0 : i64, scratch_operands = 0 : i64, tpu.core_type = #tpu.core_type<tc>, window_params = [{transform_indices = @transform_0, window_bounds = array<i64: 256, 128>}, {pipeline_mode = #tpu.pipeline_mode<synchronous>, transform_indices = @transform_1, window_bounds = array<i64: 128, 128>}, {transform_indices = @transform_2, window_bounds = array<i64: 256, 128>}]} {
    %c0 = arith.constant 0 : index
    %c0_0 = arith.constant 0 : index
    %0 = vector.load %arg1[%c0, %c0_0] : memref<256x128xbf16, #tpu.memory_space<vmem>>, vector<256x128xbf16>
    %c0_1 = arith.constant 0 : index
    %c0_2 = arith.constant 0 : index
    %1 = vector.load %arg2[%c0_1, %c0_2] : memref<128x128xbf16, #tpu.memory_space<vmem>>, vector<128x128xbf16>
    %cst = arith.constant dense<0.000000e+00> : vector<256x128xf32>
    %2 = tpu.matmul %0, %1, %cst {dimension_numbers = #tpu.dot_dimension_numbers<[1], [0], [0], [1], [0, 0, 1, 1], [], []>} : vector<256x128xbf16>, vector<128x128xbf16>, vector<256x128xf32> -> vector<256x128xf32>
    %3 = arith.truncf %2 : vector<256x128xf32> to vector<256x128xbf16>
    %c0_3 = arith.constant 0 : index
    %c0_4 = arith.constant 0 : index
    %4 = vector.load %arg3[%c0_3, %c0_4] : memref<256x128xbf16, #tpu.memory_space<vmem>>, vector<256x128xbf16>
    tpu.vector_store %arg3[%c0_3, %c0_4], %3 {strides = array<i32>} : memref<256x128xbf16, #tpu.memory_space<vmem>>, vector<256x128xbf16>,
    return
  }
  func.func @transform_0(%arg0: i32) -> (i32, i32) {
    %c0_i32 = arith.constant 0 : i32
    %c0_i32_0 = arith.constant 0 : i32
    return %arg0, %c0_i32 : i32, i32
  }
  func.func @transform_1(%arg0: i32) -> (i32, i32) {
    %c0_i32 = arith.constant 0 : i32
    %c0_i32_0 = arith.constant 0 : i32
    %c0_i32_1 = arith.constant 0 : i32
    return %c0_i32, %c0_i32_0 : i32, i32
  }
  func.func @transform_2(%arg0: i32) -> (i32, i32) {
    %c0_i32 = arith.constant 0 : i32
    %c0_i32_0 = arith.constant 0 : i32
    return %arg0, %c0_i32 : i32, i32
  }
}

</mosaic_0001>

<bundles_post_ra>
// kernel: tpu_custom_call.1
= control target key start
LH: loop header
LB: loop body
LE: loop exit
PB: predicated region body
PF: predicated region fallthrough
CT: control target
= control target key end

     0   :  { %7 = vsyncpa [#allocation3], 0  ;;  %s1009_s0 = inlined_call_operand.hbm [shape: bf16[256,128], index: 0, kind: input, shape index: {}]   ;;  %s1010_s1 = inlined_call_operand.hbm [shape: bf16[128,128], index: 1, kind: input, shape index: {}]   ;;  %s1011_s2 = inlined_call_operand.hbm [shape: bf16[256,128], index: 2, kind: output, shape index: {}]  }
   0x1   :  { %8 = vsyncpa [#allocation6], 0 }
   0x2   :  { %9 = vsyncpa [#allocation4], 0  ;;  %s944_s9 = smov [#allocation2]   ;;  %s872_s13 = scalar_lea.hbm %s1009_s0, 2048 }
   0x3   :  { %s15_s10 = sshll.u32 %s944_s9, 4  ;;  %p873_p0 = scmp.ne.s32.totalorder %s1009_s0, %s872_s13  ;;  %s16_s10 = int_to_ptr.vmem [resolvable:$true] %s15_s10 }
   0x4   :  { %p876_p1 = scmp.lt.u32.totalorder %s872_s13, %s1009_s0 }
   0x6   :  { %p878_p2 = pnand %p876_p1, %p873_p0 }
   0x8   :  { %881 = shalt.err (!%p878_p2)
}
   0x9   :  { %s882_s18 = scalar_lea.vmem %s16_s10, 2048  ;;  %p887_p4 = scmp.lt.s32.totalorder %s16_s10, %s16_s10 }
   0xa   :  { %p883_p3 = scmp.ne.s32.totalorder %s16_s10, %s882_s18  ;;  %p888_p5 = scmp.lt.s32.totalorder %s882_s18, %s882_s18 }
   0xc   :  { %p889_p6 = por %p888_p5, %p887_p4 }
   0xe   :  { %p890_p7 = pnand %p889_p6, %p883_p3 }
  0x10   :  { %893 = shalt.err (!%p890_p7)
}
  0x11   :  { %s945_s19 = smov 64   ;;  %s946_s20 = smov 4  }
  0x12   :  { %21 = dma.hbm_to_vmem [thread:$0]  %s1009_s0, 2048, %s16_s10, [#allocation3], %s945_s19, %s945_s19, %s946_s20  }
  0x13   :  { %s947_s23 = smov [#allocation5]   ;;  %s894_s27 = scalar_lea.hbm %s1010_s1, 1024 }
  0x14   :  { %s27_s24 = sshll.u32 %s947_s23, 4  ;;  %p895_p8 = scmp.ne.s32.totalorder %s1010_s1, %s894_s27  ;;  %s28_s24 = int_to_ptr.vmem [resolvable:$true] %s27_s24 }
  0x15   :  { %p898_p9 = scmp.lt.u32.totalorder %s894_s27, %s1010_s1 }
  0x17   :  { %p900_p10 = pnand %p898_p9, %p895_p8 }
  0x19   :  { %903 = shalt.err (!%p900_p10)
}
  0x1a   :  { %s904_s4 = scalar_lea.vmem %s28_s24, 1024  ;;  %p909_p12 = scmp.lt.s32.totalorder %s28_s24, %s28_s24 }
  0x1b   :  { %p905_p11 = scmp.ne.s32.totalorder %s28_s24, %s904_s4  ;;  %p910_p13 = scmp.lt.s32.totalorder %s904_s4, %s904_s4 }
  0x1d   :  { %p911_p0 = por %p910_p13, %p909_p12 }
  0x1f   :  { %p912_p1 = pnand %p911_p0, %p905_p11 }
  0x21   :  { %915 = shalt.err (!%p912_p1)
}
  0x22   :  { %33 = dma.hbm_to_vmem [thread:$0]  %s1010_s1, 1024, %s28_s24, [#allocation6], %s945_s19, %s945_s19, %s946_s20  }
  0x23   :  { %938 = dma.done.wait [#allocation3], 2048  }
  0x24   :  { %939 = vsyncadd [#allocation3], 4294965248 }
  0x25   :  { %940 = dma.done.wait [#allocation6], 1024  }
  0x26   :  { %941 = vsyncadd [#allocation6], 4294966272  ;;  %v848_v0 = vld [vmem:[#allocation5] sm:$0xff]   ;;  %v849_v1 = vld [vmem:[#allocation5 + $0x8] sm:$0xff]   ;;  %s948_s1 = smov [#allocation7]  }
  0x27   :  { %779 = vmatprep.subr.bf16.mxu0 %v848_v0  ;;  %827 = vmatprep.subr.bf16.mxu1 %v848_v0  ;;  %v850_v2 = vld [vmem:[#allocation5 + $0x10] sm:$0xff]   ;;  %v851_v3 = vld [vmem:[#allocation5 + $0x18] sm:$0xff]   ;;  %v856_v4 = vld [vmem:[#allocation2] sm:$0xff]   ;;  %s559_s6 = sshll.u32 %s948_s1, 4  ;;  %s560_s6 = int_to_ptr.vmem [resolvable:$true] %s559_s6 }
  0x28   :  { %780 = vmatpush3.bf16.msra.mxu0 %v848_v0  ;;  %835 = vmatpush3.bf16.msra.mxu1 %v848_v0  ;;  %v857_v5 = vld [vmem:[#allocation2 + $0x40] sm:$0xff]   ;;  %v853_v7 = vld [vmem:[#allocation5 + $0x28] sm:$0xff]   ;;  %v854_v8 = vld [vmem:[#allocation5 + $0x30] sm:$0xff]   ;;  %s916_s7 = scalar_lea.vmem %s560_s6, 2048  ;;  %p921_p3 = scmp.lt.s32.totalorder %s560_s6, %s560_s6 }
  0x29   :  { %781 = vmatprep.subr.bf16.mxu0 %v849_v1  ;;  %828 = vmatprep.subr.bf16.mxu1 %v849_v1  ;;  %v852_v6 = vld [vmem:[#allocation5 + $0x20] sm:$0xff]   ;;  %v855_v9 = vld [vmem:[#allocation5 + $0x38] sm:$0xff]   ;;  %v858_v10 = vld [vmem:[#allocation2 + $0x8] sm:$0xff]   ;;  %p917_p2 = scmp.ne.s32.totalorder %s560_s6, %s916_s7  ;;  %p922_p4 = scmp.lt.s32.totalorder %s916_s7, %s916_s7 }
  0x2a   :  { %795 = vmatprep.mubr.bf16.mxu0 %v856_v4  ;;  %811 = vmatprep.mubr.bf16.mxu1 %v857_v5  ;;  %v859_v11 = vld [vmem:[#allocation2 + $0x48] sm:$0xff]   ;;  %v860_v12 = vld [vmem:[#allocation2 + $0x10] sm:$0xff]   ;;  %v862_v14 = vld [vmem:[#allocation2 + $0x18] sm:$0xff]  }
  0x2b   :  { %v861_v13 = vld [vmem:[#allocation2 + $0x50] sm:$0xff]   ;;  %v863_v15 = vld [vmem:[#allocation2 + $0x58] sm:$0xff]   ;;  %v864_v16 = vld [vmem:[#allocation2 + $0x20] sm:$0xff]   ;;  %p923_p5 = por %p922_p4, %p921_p3 }
  0x2c   :  { %782 = vmatpush3.bf16.msra.mxu0 %v849_v1  ;;  %836 = vmatpush3.bf16.msra.mxu1 %v849_v1  ;;  %v865_v17 = vld [vmem:[#allocation2 + $0x60] sm:$0xff]   ;;  %v866_v18 = vld [vmem:[#allocation2 + $0x28] sm:$0xff]   ;;  %v868_v20 = vld [vmem:[#allocation2 + $0x30] sm:$0xff]  }
  0x2d   :  { %783 = vmatprep.subr.bf16.mxu0 %v850_v2  ;;  %829 = vmatprep.subr.bf16.mxu1 %v850_v2  ;;  %v867_v19 = vld [vmem:[#allocation2 + $0x68] sm:$0xff]   ;;  %v869_v21 = vld [vmem:[#allocation2 + $0x70] sm:$0xff]   ;;  %v870_v22 = vld [vmem:[#allocation2 + $0x38] sm:$0xff]   ;;  %p924_p6 = pnand %p923_p5, %p917_p2 }
  0x2e   :  { %v871_v23 = vld [vmem:[#allocation2 + $0x78] sm:$0xff]  }
  0x30   :  { %784 = vmatpush3.bf16.msra.mxu0 %v850_v2  ;;  %837 = vmatpush3.bf16.msra.mxu1 %v850_v2 }
  0x31   :  { %785 = vmatprep.subr.bf16.mxu0 %v851_v3  ;;  %830 = vmatprep.subr.bf16.mxu1 %v851_v3 }
  0x34   :  { %786 = vmatpush3.bf16.msra.mxu0 %v851_v3  ;;  %838 = vmatpush3.bf16.msra.mxu1 %v851_v3 }
  0x35   :  { %787 = vmatprep.subr.bf16.mxu0 %v852_v6  ;;  %831 = vmatprep.subr.bf16.mxu1 %v852_v6 }
  0x38   :  { %788 = vmatpush3.bf16.msra.mxu0 %v852_v6  ;;  %839 = vmatpush3.bf16.msra.mxu1 %v852_v6 }
  0x39   :  { %789 = vmatprep.subr.bf16.mxu0 %v853_v7  ;;  %832 = vmatprep.subr.bf16.mxu1 %v853_v7 }
  0x3c   :  { %790 = vmatpush3.bf16.msra.mxu0 %v853_v7  ;;  %840 = vmatpush3.bf16.msra.mxu1 %v853_v7 }
  0x3d   :  { %791 = vmatprep.subr.bf16.mxu0 %v854_v8  ;;  %833 = vmatprep.subr.bf16.mxu1 %v854_v8 }
  0x40   :  { %792 = vmatpush3.bf16.msra.mxu0 %v854_v8  ;;  %841 = vmatpush3.bf16.msra.mxu1 %v854_v8 }
  0x41   :  { %793 = vmatprep.subr.bf16.mxu0 %v855_v9  ;;  %834 = vmatprep.subr.bf16.mxu1 %v855_v9 }
  0x44   :  { %794 = vmatpush3.bf16.msra.mxu0 %v855_v9  ;;  %842 = vmatpush3.bf16.msra.mxu1 %v855_v9 }
  0x47   :  { %796 = vmatmul.mubr.bf16.vlgmr.msra.gmra.mrb[0].mxu0 %v858_v10  ;;  %812 = vmatmul.mubr.bf16.vlgmr.msra.gmra.mrb[0].mxu1 %v859_v11 }
  0x48   :  { %799 = vmatprep.mubr.bf16.mxu0 %v860_v12  ;;  %815 = vmatprep.mubr.bf16.mxu1 %v861_v13 }
  0x4f   :  { %800 = vmatmul.mubr.bf16.gmra.mrb[4].mxu0 %v862_v14  ;;  %816 = vmatmul.mubr.bf16.gmra.mrb[4].mxu1 %v863_v15 }
  0x50   :  { %803 = vmatprep.mubr.bf16.mxu0 %v864_v16  ;;  %819 = vmatprep.mubr.bf16.mxu1 %v865_v17 }
  0x57   :  { %804 = vmatmul.mubr.bf16.gmra.mrb[8].mxu0 %v866_v18  ;;  %820 = vmatmul.mubr.bf16.gmra.mrb[8].mxu1 %v867_v19 }
  0x58   :  { %807 = vmatprep.mubr.bf16.mxu0 %v868_v20  ;;  %823 = vmatprep.mubr.bf16.mxu1 %v869_v21 }
  0x5f   :  { %808 = vmatmul.mubr.bf16.gmra.mrb[12].mxu0 %v870_v22  ;;  %824 = vmatmul.mubr.bf16.gmra.mrb[12].mxu1 %v871_v23 }
 0x11a   :  { %v797_v24 = vpop.f32.mrb[0].mxu0  ;;  %v813_v25 = vpop.f32.mrb[0].mxu1 }
 0x11b   :  { %v267_v26 = vpop.f32.mrb[1].mxu0  ;;  %v331_v27 = vpop.f32.mrb[1].mxu1 }
 0x11c   :  { %v798_v28 = vpop.f32.mrb[2].mxu0  ;;  %v814_v29 = vpop.f32.mrb[2].mxu1 }
 0x11d   :  { %v668_v30 = vpack.c.bf16 %v798_v28, %v797_v24  ;;  %v708_v31 = vpack.c.bf16 %v814_v29, %v813_v25  ;;  %v270_v32 = vpop.f32.mrb[3].mxu0  ;;  %v334_v33 = vpop.f32.mrb[3].mxu1 }
 0x11e   :  { %v663_v34 = vpack.c.bf16 %v270_v32, %v267_v26  ;;  %v703_v35 = vpack.c.bf16 %v334_v33, %v331_v27 }
 0x11f   :  { %740 = vst [vmem:[#allocation7 + $0x8] sm:$0xff] %v668_v30   ;;  %748 = vst [vmem:[#allocation7 + $0x48] sm:$0xff] %v708_v31  }
 0x120   :  { %664 = vst [vmem:[#allocation7] sm:$0xff] %v663_v34   ;;  %747 = vst [vmem:[#allocation7 + $0x40] sm:$0xff] %v703_v35  }
 0x122   :  { %v801_v36 = vpop.f32.mrb[4].mxu0  ;;  %v817_v37 = vpop.f32.mrb[4].mxu1 }
 0x123   :  { %v283_v38 = vpop.f32.mrb[5].mxu0  ;;  %v347_v39 = vpop.f32.mrb[5].mxu1 }
 0x124   :  { %v802_v40 = vpop.f32.mrb[6].mxu0  ;;  %v818_v41 = vpop.f32.mrb[6].mxu1 }
 0x125   :  { %v678_v42 = vpack.c.bf16 %v802_v40, %v801_v36  ;;  %v718_v43 = vpack.c.bf16 %v818_v41, %v817_v37  ;;  %v286_v44 = vpop.f32.mrb[7].mxu0  ;;  %v350_v45 = vpop.f32.mrb[7].mxu1 }
 0x126   :  { %v673_v46 = vpack.c.bf16 %v286_v44, %v283_v38  ;;  %v713_v47 = vpack.c.bf16 %v350_v45, %v347_v39 }
 0x127   :  { %742 = vst [vmem:[#allocation7 + $0x18] sm:$0xff] %v678_v42   ;;  %750 = vst [vmem:[#allocation7 + $0x58] sm:$0xff] %v718_v43  }
 0x128   :  { %741 = vst [vmem:[#allocation7 + $0x10] sm:$0xff] %v673_v46   ;;  %749 = vst [vmem:[#allocation7 + $0x50] sm:$0xff] %v713_v47  }
 0x12a   :  { %v805_v48 = vpop.f32.mrb[8].mxu0  ;;  %v821_v49 = vpop.f32.mrb[8].mxu1 }
 0x12b   :  { %v299_v50 = vpop.f32.mrb[9].mxu0  ;;  %v363_v51 = vpop.f32.mrb[9].mxu1 }
 0x12c   :  { %v806_v52 = vpop.f32.mrb[10].mxu0  ;;  %v822_v53 = vpop.f32.mrb[10].mxu1 }
 0x12d   :  { %v688_v54 = vpack.c.bf16 %v806_v52, %v805_v48  ;;  %v728_v55 = vpack.c.bf16 %v822_v53, %v821_v49  ;;  %v302_v56 = vpop.f32.mrb[11].mxu0  ;;  %v366_v57 = vpop.f32.mrb[11].mxu1 }
 0x12e   :  { %v683_v58 = vpack.c.bf16 %v302_v56, %v299_v50  ;;  %v723_v59 = vpack.c.bf16 %v366_v57, %v363_v51 }
 0x12f   :  { %744 = vst [vmem:[#allocation7 + $0x28] sm:$0xff] %v688_v54   ;;  %752 = vst [vmem:[#allocation7 + $0x68] sm:$0xff] %v728_v55  }
 0x130   :  { %743 = vst [vmem:[#allocation7 + $0x20] sm:$0xff] %v683_v58   ;;  %751 = vst [vmem:[#allocation7 + $0x60] sm:$0xff] %v723_v59  }
 0x132   :  { %v809_v60 = vpop.f32.mrb[12].mxu0  ;;  %v825_v61 = vpop.f32.mrb[12].mxu1 }
 0x133   :  { %v315_v62 = vpop.f32.mrb[13].mxu0  ;;  %v379_v63 = vpop.f32.mrb[13].mxu1 }
 0x134   :  { %v810_v0 = vpop.f32.mrb[14].mxu0  ;;  %v826_v1 = vpop.f32.mrb[14].mxu1 }
 0x135   :  { %v698_v2 = vpack.c.bf16 %v810_v0, %v809_v60  ;;  %v738_v3 = vpack.c.bf16 %v826_v1, %v825_v61  ;;  %v318_v4 = vpop.f32.mrb[15].mxu0  ;;  %v382_v5 = vpop.f32.mrb[15].mxu1 }
 0x136   :  { %v693_v6 = vpack.c.bf16 %v318_v4, %v315_v62  ;;  %v733_v7 = vpack.c.bf16 %v382_v5, %v379_v63 }
 0x137   :  { %746 = vst [vmem:[#allocation7 + $0x38] sm:$0xff] %v698_v2   ;;  %754 = vst [vmem:[#allocation7 + $0x78] sm:$0xff] %v738_v3  }
 0x138   :  { %745 = vst [vmem:[#allocation7 + $0x30] sm:$0xff] %v693_v6   ;;  %753 = vst [vmem:[#allocation7 + $0x70] sm:$0xff] %v733_v7  }
 0x139   :  { %927 = shalt.err (!%p924_p6)
}
 0x13a   :  { %s928_s10 = scalar_lea.hbm %s1011_s2, 2048 }
 0x13b   :  { %p929_p7 = scmp.ne.s32.totalorder %s1011_s2, %s928_s10  ;;  %p932_p8 = scmp.lt.u32.totalorder %s928_s10, %s1011_s2 }
 0x13d   :  { %p934_p9 = pnand %p932_p8, %p929_p7 }
 0x13f   :  { %937 = shalt.err (!%p934_p9)
}
 0x140   :  { %565 = dma.vmem_to_hbm [thread:$0]  %s560_s6, 2048, %s1011_s2, [#allocation4], %s945_s19, %s945_s19, %s946_s20  }
 0x141   :  { %942 = dma.done.wait [#allocation4], 2048  }
 0x142   :  { %943 = vsyncadd [#allocation4], 4294965248 }
 0x143   :  { %569 = vsyncpa [#allocation3], 1 }
 0x144   :  { %570 = vsyncpa [#allocation6], 1 }
 0x145   :  { %571 = vsyncpa [#allocation4], 1 }

</bundles_post_ra>
